<compile_context>
chip_gen: v6e
topology: v6e:2x2x1
jax: 0.10.0
libtpu: 0.0.40
codegen_flags: <defaults>
</compile_context>

<pallas_src>
import functools

import jax
import jax.numpy as jnp
from jax.experimental import pallas as pl
from jax.experimental.pallas import tpu as pltpu


def _sublane_packing(dtype) -> int:
    """Rows per packed sublane group for a dtype (f32: 8, bf16/f16: 16, 8-bit: 32)."""
    itemsize = jnp.dtype(dtype).itemsize
    return max(8, 32 // max(itemsize, 1))


def _vmem_capacity_bytes() -> int:
    try:
        return int(pltpu.get_tpu_info().vmem_capacity_bytes)
    except Exception:
        return 64 * 1024 * 1024  # conservative: v7x per-TensorCore VMEM


def _pick_tile_rows(rows, hidden, in_bytes, out_bytes, packing, vmem_budget):
    """Largest row tile whose double-buffered in/out footprint fits the budget."""
    bytes_per_row = 2 * hidden * (in_bytes + out_bytes)  # 2x: double buffering
    t = vmem_budget // max(bytes_per_row, 1)
    t = min(int(t), 1024)
    t = max((t // packing) * packing, packing)
    if rows <= t:
        return rows  # single block; full-extent block shape is always legal
    # Keep >= 4 grid steps when possible without dropping below 256 rows
    # (keeps both v7x TensorCores and the DMA pipeline busy).
    if rows >= 4 * 256:
        cap = max(256, ((rows // 4) // packing) * packing)
        t = min(t, cap)
    return t


def _rmsnorm_kernel(x_ref, w_ref, o_ref, *, eps, inv_h, cast_to_weight_dtype):
    # x_ref: (TILE_R, H), w_ref: (1, H), o_ref: (TILE_R, H)
    x = x_ref[...].astype(jnp.float32)
    # mean(x^2) as sum * (1/H): keeps a per-tile divide off the VALU path.
    variance = jnp.sum(x * x, axis=-1, keepdims=True) * inv_h
    y = x * jax.lax.rsqrt(variance + eps)
    w = w_ref[...]
    if cast_to_weight_dtype:
        # torch: hidden_states.to(weight.dtype) when weight is fp16/bf16
        o_ref[...] = (w * y.astype(w.dtype)).astype(o_ref.dtype)
    else:
        o_ref[...] = (w.astype(jnp.float32) * y).astype(o_ref.dtype)


def rms_norm(x, weight, eps=1e-6, tile_rows=None):
    """RMSNorm over the last axis of x, scaled by `weight` of shape (hidden,)."""
    orig_shape = x.shape
    hidden = orig_shape[-1]
    rows = 1
    for d in orig_shape[:-1]:
        rows *= d
    x2d = x.reshape(rows, hidden)
    w2d = weight.reshape(1, hidden)  # lane-dense (1, H) layout

    # torch semantics: math in f32; if weight is fp16/bf16, the normalized
    # activations are cast to the weight dtype before scaling (low-prec output).
    w_dtype = jnp.dtype(weight.dtype)
    cast_to_weight_dtype = w_dtype in (jnp.dtype(jnp.float16), jnp.dtype(jnp.bfloat16))
    out_dtype = w_dtype if cast_to_weight_dtype else jnp.promote_types(jnp.float32, w_dtype)

    in_bytes = jnp.dtype(x.dtype).itemsize
    out_bytes = jnp.dtype(out_dtype).itemsize
    packing = _sublane_packing(x.dtype)

    vmem_cap = _vmem_capacity_bytes()
    tile_budget = int(vmem_cap * 0.6)  # leave headroom for weight / compiler scratch

    if tile_rows is None:
        tile_r = _pick_tile_rows(rows, hidden, in_bytes, out_bytes, packing, tile_budget)
    else:
        tile_r = min(int(tile_rows), rows)
        if tile_r < rows:
            tile_r = max(8, (tile_r // 8) * 8)  # hard (8, 128) block constraint

    grid = (pl.cdiv(rows, tile_r),)

    # Explicit VMEM limit: double-buffered in/out tiles + weight + slack.
    vmem_needed = (2 * tile_r * hidden * (in_bytes + out_bytes)
                   + 2 * hidden * w_dtype.itemsize)
    vmem_limit = int(vmem_needed * 1.25) + (4 << 20)
    vmem_limit = max(16 << 20, min(vmem_limit, vmem_cap - (4 << 20)))

    kernel = functools.partial(
        _rmsnorm_kernel,
        eps=float(eps),
        inv_h=float(1.0 / hidden),
        cast_to_weight_dtype=cast_to_weight_dtype,
    )

    out = pl.pallas_call(
        kernel,
        out_shape=jax.ShapeDtypeStruct((rows, hidden), out_dtype),
        grid_spec=pltpu.PrefetchScalarGridSpec(
            num_scalar_prefetch=0,
            grid=grid,
            in_specs=[
                pl.BlockSpec((tile_r, hidden), lambda i: (i, 0)),
                pl.BlockSpec((1, hidden), lambda i: (0, 0)),
            ],
            out_specs=pl.BlockSpec((tile_r, hidden), lambda i: (i, 0)),
        ),
        compiler_params=pltpu.CompilerParams(
            dimension_semantics=("parallel",),
            vmem_limit_bytes=vmem_limit,
        ),
    )(x2d, w2d)

    return out.reshape(orig_shape)


def rms_norm_reference(x, weight, eps=1e-6):
    xf = x.astype(jnp.float32)
    variance = jnp.mean(xf * xf, axis=-1, keepdims=True)
    y = xf * jax.lax.rsqrt(variance + eps)
    if jnp.dtype(weight.dtype) in (jnp.dtype(jnp.float16), jnp.dtype(jnp.bfloat16)):
        y = y.astype(weight.dtype)
    return weight * y


if __name__ == "__main__":
    key = jax.random.PRNGKey(0)
    k1, k2, k3 = jax.random.split(key, 3)

    # Case 1: f32, matches the module's intended use (batch=2, seq=8, hidden=32).
    batch, seq, hidden = 2, 8, 32
    x = jax.random.normal(k1, (batch, seq, hidden), dtype=jnp.float32)
    weight = jnp.ones((hidden,), dtype=jnp.float32)  # torch.ones(hidden_size)
    out = jax.block_until_ready(rms_norm(x, weight, eps=1e-6))
    ref = rms_norm_reference(x, weight, eps=1e-6)
    assert out.shape == (batch, seq, hidden)
    assert out.dtype == jnp.float32
    assert jnp.allclose(out, ref, atol=1e-5, rtol=1e-5), "f32 mismatch vs reference"

    # Case 2: rows not divisible by the tile -> exercises the cdiv / masked-tail path.
    x2 = jax.random.normal(k2, (5, 4, 128), dtype=jnp.float32)  # rows = 20
    w2 = 1.0 + 0.1 * jax.random.normal(k3, (128,), dtype=jnp.float32)
    out2 = jax.block_until_ready(rms_norm(x2, w2, eps=1e-6, tile_rows=8))
    ref2 = rms_norm_reference(x2, w2, eps=1e-6)
    assert jnp.allclose(out2, ref2, atol=1e-5, rtol=1e-5), "ragged-rows mismatch"

    # Case 3: bf16 input + bf16 weight -> bf16 output (torch low-precision branch).
    x3 = jax.random.normal(k2, (3, 8, 256), dtype=jnp.float32).astype(jnp.bfloat16)
    w3 = jnp.ones((256,), dtype=jnp.bfloat16)
    out3 = jax.block_until_ready(rms_norm(x3, w3, eps=1e-6))
    ref3 = rms_norm_reference(x3, w3, eps=1e-6)
    assert out3.dtype == jnp.bfloat16
    assert jnp.allclose(out3.astype(jnp.float32), ref3.astype(jnp.float32),
                        atol=2e-2, rtol=2e-2), "bf16 mismatch vs reference"

    print("KERNEL_OK")
</pallas_src>

<mosaic_0001>
module attributes {stable_mosaic.version = 11 : i64} {
  func.func @_rmsnorm_kernel(%arg0: i32, %arg1: memref<16x32xf32, #tpu.memory_space<vmem>>, %arg2: memref<1x32xf32, #tpu.memory_space<vmem>>, %arg3: memref<16x32xf32, #tpu.memory_space<vmem>>) attributes {dimension_semantics = [#tpu.dimension_semantics<parallel>], iteration_bounds = array<i64: 1>, scalar_prefetch = 0 : i64, scratch_operands = 0 : i64, tpu.core_type = #tpu.core_type<tc>, window_params = [{transform_indices = @transform_0, window_bounds = array<i64: 16, 32>}, {pipeline_mode = #tpu.pipeline_mode<synchronous>, transform_indices = @transform_1, window_bounds = array<i64: 1, 32>}, {transform_indices = @transform_2, window_bounds = array<i64: 16, 32>}]} {
    %c0 = arith.constant 0 : index
    %c0_0 = arith.constant 0 : index
    %0 = vector.load %arg1[%c0, %c0_0] : memref<16x32xf32, #tpu.memory_space<vmem>>, vector<16x32xf32>
    %1 = arith.mulf %0, %0 : vector<16x32xf32>
    %cst = arith.constant dense<0.000000e+00> : vector<16xf32>
    %2 = vector.multi_reduction <add>, %1, %cst [1] : vector<16x32xf32> to vector<16xf32>
    %3 = vector.shape_cast %2 : vector<16xf32> to vector<16x1xf32>
    %cst_1 = arith.constant 3.125000e-02 : f32
    %4 = vector.broadcast %cst_1 : f32 to vector<16x1xf32>
    %5 = arith.mulf %3, %4 : vector<16x1xf32>
    %cst_2 = arith.constant 9.99999997E-7 : f32
    %6 = vector.broadcast %cst_2 : f32 to vector<16x1xf32>
    %7 = arith.addf %5, %6 : vector<16x1xf32>
    %8 = math.rsqrt %7 : vector<16x1xf32>
    %9 = vector.broadcast %8 : vector<16x1xf32> to vector<16x32xf32>
    %10 = arith.mulf %0, %9 : vector<16x32xf32>
    %c0_3 = arith.constant 0 : index
    %c0_4 = arith.constant 0 : index
    %11 = vector.load %arg2[%c0_3, %c0_4] : memref<1x32xf32, #tpu.memory_space<vmem>>, vector<1x32xf32>
    %12 = vector.broadcast %11 : vector<1x32xf32> to vector<16x32xf32>
    %13 = arith.mulf %12, %10 : vector<16x32xf32>
    %c0_5 = arith.constant 0 : index
    %c0_6 = arith.constant 0 : index
    %14 = vector.load %arg3[%c0_5, %c0_6] : memref<16x32xf32, #tpu.memory_space<vmem>>, vector<16x32xf32>
    tpu.vector_store %arg3[%c0_5, %c0_6], %13 {strides = array<i32>} : memref<16x32xf32, #tpu.memory_space<vmem>>, vector<16x32xf32>,
    return
  }
  func.func @transform_0(%arg0: i32) -> (i32, i32) {
    %c0_i32 = arith.constant 0 : i32
    %c0_i32_0 = arith.constant 0 : i32
    return %arg0, %c0_i32 : i32, i32
  }
  func.func @transform_1(%arg0: i32) -> (i32, i32) {
    %c0_i32 = arith.constant 0 : i32
    %c0_i32_0 = arith.constant 0 : i32
    %c0_i32_1 = arith.constant 0 : i32
    return %c0_i32, %c0_i32_0 : i32, i32
  }
  func.func @transform_2(%arg0: i32) -> (i32, i32) {
    %c0_i32 = arith.constant 0 : i32
    %c0_i32_0 = arith.constant 0 : i32
    return %arg0, %c0_i32 : i32, i32
  }
}

</mosaic_0001>

<bundles_post_ra>
// kernel: tpu_custom_call.1
= control target key start
LH: loop header
LB: loop body
LE: loop exit
PB: predicated region body
PF: predicated region fallthrough
CT: control target
= control target key end

     0   :  { %7 = vsyncpa [#allocation3], 0  ;;  %s164_s0 = inlined_call_operand.hbm [shape: f32[16,32], index: 0, kind: input, shape index: {}]   ;;  %s165_s1 = inlined_call_operand.vmem [shape: f32[1,32], index: 1, kind: input, shape index: {}]   ;;  %s166_s2 = inlined_call_operand.hbm [shape: f32[16,32], index: 2, kind: output, shape index: {}]  }
   0x1   :  { %8 = vsyncpa [#allocation4], 0  ;;  %s126_s9 = smov [#allocation2]  }
   0x2   :  { %s14_s10 = sshll.u32 %s126_s9, 4  ;;  %s15_s10 = int_to_ptr.vmem [resolvable:$true] %s14_s10 }
   0x3   :  { %s90_s11 = scalar_lea.vmem %s15_s10, 256  ;;  %p95_p1 = scmp.lt.s32.totalorder %s15_s10, %s15_s10 }
   0x4   :  { %p91_p0 = scmp.ne.s32.totalorder %s15_s10, %s90_s11  ;;  %p96_p2 = scmp.lt.s32.totalorder %s90_s11, %s90_s11 }
   0x6   :  { %p97_p3 = por %p96_p2, %p95_p1 }
   0x8   :  { %p98_p4 = pnand %p97_p3, %p91_p0 }
   0xa   :  { %101 = shalt.err (!%p98_p4)
}
   0xb   :  { %s127_s12 = smov 128   ;;  %s128_s13 = smov 8  }
   0xc   :  { %20 = dma.hbm_to_vmem [thread:$0]  %s164_s0, 256, %s15_s10, [#allocation3], %s127_s12, %s127_s12, %s128_s13  }
   0xd   :  { %122 = dma.done.wait [#allocation3], 256  }
   0xe   :  { %123 = vsyncadd [#allocation3], 4294967040  ;;  %v26_v0 = vld [vmem:[#allocation2] sm:$0xff]  ;;  %vm30_vm0 = vcmask 261120   ;;  %v27_v1 = vld [vmem:[#allocation2 + $0x8] sm:$0xff]  ;;  %s129_s17 = smov [#allocation5]  }
   0xf   :  { %v28_v2 = vmul.f32 %v26_v0, %v26_v0  ;;  %v29_v3 = vmul.f32 %v27_v1, %v27_v1  ;;  %v73_v13 = vld [vmem:[%s165_s1] ss:$0 sm:$0xff]  ;;  %s61_s18 = sshll.u32 %s129_s17, 4  ;;  %s62_s18 = int_to_ptr.vmem [resolvable:$true] %s61_s18 }
  0x10   :  { %s102_s19 = scalar_lea.vmem %s62_s18, 256  ;;  %p107_p6 = scmp.lt.s32.totalorder %s62_s18, %s62_s18 }
  0x11   :  { %v31_v4 = vsel %vm30_vm0, %v28_v2, 0.0  ;;  %v34_v5 = vsel %vm30_vm0, %v29_v3, 0.0  ;;  %p103_p5 = scmp.ne.s32.totalorder %s62_s18, %s102_s19  ;;  %p108_p7 = scmp.lt.s32.totalorder %s102_s19, %s102_s19 }
  0x12   :  { %32 = vadd.xlane.f32.xlu0 %v31_v4 }
  0x13   :  { %p109_p8 = por %p108_p7, %p107_p6 }
  0x15   :  { %p110_p9 = pnand %p109_p8, %p103_p5 }
  0x16   :  { %35 = vadd.xlane.f32.xlu0 %v34_v5 }
  0x9b   :  { %v33_v6 = vpop.xlane.xlu0 %32 }
  0x9c   :  { %v37_v7 = vmul.f32 0.03125, %v33_v6 }
  0x9e   :  { %v39_v8 = vadd.f32 1e-06, %v37_v7 }
  0x9f   :  { %v36_v9 = vpop.xlane.xlu0 %35 }
  0xa0   :  { %78 = vrsqrt.f32 %v39_v8  ;;  %v38_v10 = vmul.f32 0.03125, %v36_v9 }
  0xa2   :  { %v40_v11 = vadd.f32 1e-06, %v38_v10 }
  0xa4   :  { %80 = vrsqrt.f32 %v40_v11 }
  0xad   :  { %v79_v12 = vpop.eup %78 }
  0xae   :  { %v43_v14 = vmul.f32 %v79_v12, %v26_v0 }
  0xb0   :  { %v52_v15 = vmul.f32 %v73_v13, %v43_v14 }
  0xb1   :  { %v81_v16 = vpop.eup %80 }
  0xb2   :  { %v44_v17 = vmul.f32 %v81_v16, %v27_v1  ;;  %54 = vst.msk [vmem:[#allocation5] sm:$0xff] %vm30_vm0, %v52_v15 }
  0xb4   :  { %v53_v18 = vmul.f32 %v73_v13, %v44_v17 }
  0xb6   :  { %55 = vst.msk [vmem:[#allocation5 + $0x8] sm:$0xff] %vm30_vm0, %v53_v18 }
  0xb7   :  { %113 = shalt.err (!%p110_p9)
}
  0xb8   :  { %67 = dma.vmem_to_hbm [thread:$0]  %s62_s18, 256, %s166_s2, [#allocation4], %s127_s12, %s127_s12, %s128_s13  }
  0xb9   :  { %124 = dma.done.wait [#allocation4], 256  }
  0xba   :  { %125 = vsyncadd [#allocation4], 4294967040 }
  0xbb   :  { %71 = vsyncpa [#allocation3], 1 }
  0xbc   :  { %72 = vsyncpa [#allocation4], 1 }

</bundles_post_ra>
